<compile_context>
chip_gen: v7x
topology: tpu7x:2x2x1
jax: 0.10.0
libtpu: 0.0.40
codegen_flags: <defaults>
</compile_context>

<pallas_src>
from functools import partial

import jax
import jax.numpy as jnp
from jax.experimental import pallas as pl
from jax.experimental.pallas import tpu as pltpu

_LANE = 128
_TARGET_BLOCK_BYTES = 4 << 20    # ~4 MiB blocks: 2x(in+out) buffers = 16 MiB,
                                 # safe on every generation incl. v7x.
_DEFAULT_VMEM_LIMIT = 32 << 20


def _copy_kernel(x_ref, o_ref):
    # Identity copy of one lane-dense (block_rows, cols) slab.
    o_ref[...] = x_ref[...]


def _sublane_granularity(dtype):
    """Sublane packing granularity per dtype (8 for 4B, 16 for 2B, 32 for 1B)."""
    itemsize = jnp.dtype(dtype).itemsize
    if itemsize >= 4:
        return 8
    if itemsize == 2:
        return 16
    return 32


def _scoped_vmem_limit():
    """Generation-aware scoped VMEM limit: ~75% of physical, capped at 64 MiB."""
    try:
        cap = pltpu.get_tpu_info().vmem_capacity_bytes
        return int(min((cap * 3) // 4, 64 << 20))
    except Exception:
        return _DEFAULT_VMEM_LIMIT


def _choose_cols(n, itemsize, sublane):
    """Widest multiple-of-128 divisor of n such that one sublane-group of rows
    still fits the block byte target (lane-dense, unmasked vst runs)."""
    max_cols = max(_LANE, (_TARGET_BLOCK_BYTES // (itemsize * sublane)) // _LANE * _LANE)
    c = (min(max_cols, n) // _LANE) * _LANE
    while c > _LANE:
        if n % c == 0:
            return c
        c -= _LANE
    return _LANE


def _choose_block_rows(rows, cols, itemsize, sublane):
    """Row-block size: multiple of the sublane granularity near the byte
    target; guarantees >= 2 grid steps when splittable (v7x dual TensorCore)."""
    target_rows = max(1, _TARGET_BLOCK_BYTES // (cols * itemsize))
    if rows <= target_rows:
        block_rows = rows                      # full row extent (always legal)
    else:
        block_rows = max(sublane, (target_rows // sublane) * sublane)
    if pl.cdiv(rows, block_rows) < 2 and rows > sublane:
        half = pl.cdiv(rows, 2)
        block_rows = min(rows, ((half + sublane - 1) // sublane) * sublane)
    return block_rows


@partial(jax.jit, static_argnums=(1,), donate_argnums=(0,))
def _copy_2d(flat, block_rows):
    rows, cols = flat.shape
    grid = (pl.cdiv(rows, block_rows),)
    return pl.pallas_call(
        _copy_kernel,
        out_shape=jax.ShapeDtypeStruct((rows, cols), flat.dtype),
        grid=grid,
        in_specs=[pl.BlockSpec((block_rows, cols), lambda i: (i, 0))],
        out_specs=pl.BlockSpec((block_rows, cols), lambda i: (i, 0)),
        input_output_aliases={0: 0},
        compiler_params=pltpu.CompilerParams(
            dimension_semantics=("parallel",),
            vmem_limit_bytes=_scoped_vmem_limit(),
        ),
    )(flat)


def unsqueeze_pallas(x, dim):
    """Pallas equivalent of torch.Tensor.unsqueeze(dim)."""
    ndim = x.ndim
    if not (-(ndim + 1) <= dim <= ndim):
        raise ValueError(f"dim {dim} out of range for rank-{ndim} input")
    if dim < 0:
        dim += ndim + 1
    out_shape = x.shape[:dim] + (1,) + x.shape[dim:]

    n = x.size
    if n == 0 or n % _LANE != 0:
        # unsqueeze is metadata-only; for empty or non-lane-aligned totals the
        # review recommends skipping the copy kernel rather than doing a
        # whole-tensor (1, n) block that blows the VMEM budget.
        return jnp.reshape(x, out_shape)

    itemsize = jnp.dtype(x.dtype).itemsize
    sublane = _sublane_granularity(x.dtype)
    cols = _choose_cols(n, itemsize, sublane)
    rows = n // cols
    block_rows = _choose_block_rows(rows, cols, itemsize, sublane)

    # Wrapper-side reshape of a contiguous buffer: free layout plumbing that
    # presents a lane-dense 2D slab to the kernel. `flat` is a temporary, so
    # donating it into the aliased pallas_call is safe and avoids a second
    # full-size HBM buffer.
    flat = jnp.reshape(x, (rows, cols))
    out2d = _copy_2d(flat, block_rows)

    # Insert the size-1 axis (pure metadata, matches torch unsqueeze).
    return jnp.reshape(out2d, out_shape)


if __name__ == "__main__":
    key = jax.random.PRNGKey(0)
    # Small NCHW input consistent with the module's typical use.
    x = jax.random.normal(key, (2, 4, 16, 16), dtype=jnp.float32)
    dim = 1  # (B, C, H, W) -> (B, 1, C, H, W), same as torch's x.unsqueeze(1)

    out = unsqueeze_pallas(x, dim)
    out = jax.block_until_ready(out)

    # Correctness check against plain JAX (== torch unsqueeze).
    ref = jnp.expand_dims(x, dim)
    assert out.shape == ref.shape, (out.shape, ref.shape)
    assert out.dtype == ref.dtype
    assert jnp.array_equal(out, ref), "unsqueeze mismatch"

    print("KERNEL_OK")
</pallas_src>

<mosaic_0001>
module attributes {stable_mosaic.version = 11 : i64} {
  func.func @_copy_kernel(%arg0: i32, %arg1: memref<1x2048xf32, #tpu.memory_space<vmem>>, %arg2: memref<1x2048xf32, #tpu.memory_space<vmem>>) attributes {dimension_semantics = [#tpu.dimension_semantics<parallel>], iteration_bounds = array<i64: 1>, scalar_prefetch = 0 : i64, scratch_operands = 0 : i64, tpu.core_type = #tpu.core_type<tc>, window_params = [{transform_indices = @transform_0, window_bounds = array<i64: 1, 2048>}, {transform_indices = @transform_1, window_bounds = array<i64: 1, 2048>}]} {
    %c0 = arith.constant 0 : index
    %c0_0 = arith.constant 0 : index
    %0 = vector.load %arg1[%c0, %c0_0] : memref<1x2048xf32, #tpu.memory_space<vmem>>, vector<1x2048xf32>
    %c0_1 = arith.constant 0 : index
    %c0_2 = arith.constant 0 : index
    %1 = vector.load %arg2[%c0_1, %c0_2] : memref<1x2048xf32, #tpu.memory_space<vmem>>, vector<1x2048xf32>
    tpu.vector_store %arg2[%c0_1, %c0_2], %0 {strides = array<i32>} : memref<1x2048xf32, #tpu.memory_space<vmem>>, vector<1x2048xf32>,
    return
  }
  func.func @transform_0(%arg0: i32) -> (i32, i32) {
    %c0_i32 = arith.constant 0 : i32
    %c0_i32_0 = arith.constant 0 : i32
    return %arg0, %c0_i32 : i32, i32
  }
  func.func @transform_1(%arg0: i32) -> (i32, i32) {
    %c0_i32 = arith.constant 0 : i32
    %c0_i32_0 = arith.constant 0 : i32
    return %arg0, %c0_i32 : i32, i32
  }
}

</mosaic_0001>

<bundles_post_ra>
// kernel: _copy_2d.1
= control target key start
LH: loop header
LB: loop body
LE: loop exit
PB: predicated region body
PF: predicated region fallthrough
CT: control target
= control target key end

     0   :  { %6 = vsyncpa [#allocation3], 0  ;;  %s126_s0 = inlined_call_operand.hbm [shape: f32[1,2048], index: 0, kind: input, shape index: {}, may-alias: {0,1}]   ;;  %s127_s1 = inlined_call_operand.hbm [shape: f32[1,2048], index: 1, kind: output, shape index: {}, may-alias: {0,1}]  }
   0x1   :  { %7 = vsyncpa [#allocation4], 0  ;;  %s90_s6 = smov [#allocation2]   ;;  %s42_s10 = scalar_lea.hbm %s126_s0, 256 }
   0x2   :  { %s14_s7 = sshll.u32 %s90_s6, 4  ;;  %p43_p0 = scmp.ne.s32.totalorder %s126_s0, %s42_s10  ;;  %s15_s7 = int_to_ptr.vmem [resolvable:$true] %s14_s7 }
   0x3   :  { %p46_p1 = scmp.lt.u32.totalorder %s42_s10, %s126_s0 }
   0x5   :  { %p48_p2 = pnand %p46_p1, %p43_p0 }
   0x7   :  { %51 = shalt.err (!%p48_p2)
}
   0x8   :  { %s52_s15 = scalar_lea.vmem %s15_s7, 256  ;;  %p57_p4 = scmp.lt.s32.totalorder %s15_s7, %s15_s7 }
   0x9   :  { %p53_p3 = scmp.ne.s32.totalorder %s15_s7, %s52_s15  ;;  %p58_p5 = scmp.lt.s32.totalorder %s52_s15, %s52_s15 }
   0xb   :  { %p59_p6 = por %p58_p5, %p57_p4 }
   0xd   :  { %p60_p7 = pnand %p59_p6, %p53_p3 }
   0xf   :  { %63 = shalt.err (!%p60_p7)
}
  0x10   :  { %17 = dma.hbm_to_vmem [thread:$0]  %s126_s0, 256, %s15_s7, [#allocation3]  }
  0x11   :  { %86 = dma.done.wait [#allocation3], 256  }
  0x12   :  { %87 = vsyncadd [#allocation3], 4294967040  ;;  %s91_s18 = smov [#allocation5]   ;;  %v21_v0 = vld [vmem:[#allocation2] sm:$0xff]  ;;  %v22_v1 = vld [vmem:[#allocation2 + $0x8] sm:$0xff] }
  0x13   :  { %s31_s19 = sshll.u32 %s91_s18, 4  ;;  %23 = vst [vmem:[#allocation5] sm:$0xff] %v21_v0  ;;  %24 = vst [vmem:[#allocation5 + $0x8] sm:$0xff] %v22_v1  ;;  %s32_s19 = int_to_ptr.vmem [resolvable:$true] %s31_s19 }
  0x14   :  { %s64_s20 = scalar_lea.vmem %s32_s19, 256  ;;  %p69_p9 = scmp.lt.s32.totalorder %s32_s19, %s32_s19 }
  0x15   :  { %p65_p8 = scmp.ne.s32.totalorder %s32_s19, %s64_s20  ;;  %p70_p10 = scmp.lt.s32.totalorder %s64_s20, %s64_s20 }
  0x17   :  { %p71_p11 = por %p70_p10, %p69_p9 }
  0x19   :  { %p72_p12 = pnand %p71_p11, %p65_p8 }
  0x1b   :  { %75 = shalt.err (!%p72_p12)
}
  0x1c   :  { %s76_s0 = scalar_lea.hbm %s127_s1, 256 }
  0x1d   :  { %p77_p13 = scmp.ne.s32.totalorder %s127_s1, %s76_s0  ;;  %p80_p0 = scmp.lt.u32.totalorder %s76_s0, %s127_s1 }
  0x1f   :  { %p82_p1 = pnand %p80_p0, %p77_p13 }
  0x21   :  { %85 = shalt.err (!%p82_p1)
}
  0x22   :  { %34 = dma.vmem_to_hbm [thread:$0]  %s32_s19, 256, %s127_s1, [#allocation4]  }
  0x23   :  { %88 = dma.done.wait [#allocation4], 256  }
  0x24   :  { %89 = vsyncadd [#allocation4], 4294967040 }
  0x25   :  { %38 = vsyncpa [#allocation3], 1 }
  0x26   :  { %39 = vsyncpa [#allocation4], 1 }

</bundles_post_ra>
